<compile_context>
chip_gen: v5e
topology: v5e:2x2
jax: 0.10.0
libtpu: 0.0.40
codegen_flags: <defaults>
</compile_context>

<pallas_src>
import jax
import jax.numpy as jnp
from jax.experimental import pallas as pl
from jax.experimental.pallas import tpu as pltpu

LANE = 128


def _round_up(n, m):
    return ((n + m - 1) // m) * m


# ------------------------------- kernel math ---------------------------------

def _mish(h):
    # Mish(h) = h * tanh(softplus(h)) = h * (t^2 + 2t) / (t^2 + 2t + 2), t = e^h.
    # min(h, 20) is lossless in fp32 (the ratio is exactly 1.0 there) and avoids
    # exp overflow (inf/inf = NaN).  Exact divide (no approx reciprocal) for parity.
    t = jnp.exp(jnp.minimum(h, 20.0))
    u = t * (t + 2.0)
    return h * (u / (u + 2.0))


def _layer_norm(h, gamma, beta):
    # Two independent reductions (sum, sum of squares); gamma folded into the
    # rsqrt scale before the broadcast multiply.  All f32.
    inv_n = 1.0 / h.shape[-1]
    mu = jnp.sum(h, axis=-1, keepdims=True) * inv_n
    ex2 = jnp.sum(h * h, axis=-1, keepdims=True) * inv_n
    var = ex2 - mu * mu
    scale = gamma * jax.lax.rsqrt(var + 1e-5)
    return (h - mu) * scale + beta


# ------------------------------- Pallas kernel --------------------------------

def _q_ensemble_kernel(x_ref, w1_ref, ln1_ref, w2_ref, ln2_ref, w3_ref, b3_ref,
                       o_ref):
    """One batch tile, full ensemble (weights VMEM-resident, single-buffered).

    x_ref   [TB, in_dim]     f32
    w1_ref  [in_dim, Q*M]    bf16   ensemble-fused layer-1 weight
    ln1_ref [3, Q*M]         f32    rows = (b1, gamma1, beta1), lane-packed per member
    w2_ref  [Q, M, M]        bf16
    ln2_ref [Q, 3, M]        f32    rows = (b2, gamma2, beta2)
    w3_ref  [Q, M, NBP]      bf16   columns zero-padded to a multiple of 128
    b3_ref  [Q, 1, NBP]      f32
    o_ref   [TB, Q*NBP]      f32    lane-dense packed output slab
    """
    num_q, mlp, _ = w2_ref.shape
    nbp = w3_ref.shape[2]

    x = x_ref[...]

    # Layer 1 fused across the ensemble: ONE lane-dense bf16 MXU matmul for all
    # members, plus the bias add on the whole slab.
    h = jnp.dot(x.astype(jnp.bfloat16), w1_ref[...],
                preferred_element_type=jnp.float32)          # [TB, Q*M] f32
    h = h + ln1_ref[0:1, :]                                   # + b1 (all members)

    # Per-member tail (static unroll; num_q is small).  At production sizes
    # (mlp multiple of 128) the lane slices below are 128-aligned and the
    # per-member activations are already full-width vregs.
    for q in range(num_q):
        lo, hi = q * mlp, (q + 1) * mlp

        hq = _mish(_layer_norm(h[:, lo:hi],
                               ln1_ref[1:2, lo:hi], ln1_ref[2:3, lo:hi]))

        h2 = jnp.dot(hq.astype(jnp.bfloat16), w2_ref[q],
                     preferred_element_type=jnp.float32) + ln2_ref[q, 0:1, :]
        h2 = _mish(_layer_norm(h2, ln2_ref[q, 1:2, :], ln2_ref[q, 2:3, :]))

        # Head: 128-aligned column strip of the packed slab -> unmasked stores.
        o_ref[:, q * nbp:(q + 1) * nbp] = (
            jnp.dot(h2.astype(jnp.bfloat16), w3_ref[q],
                    preferred_element_type=jnp.float32) + b3_ref[q])


def q_function_forward(a, z, packed, *, num_bins):
    """QFunction.forward with return_type='all'.

    a: [B, action_dim], z: [B, latent_dim]  ->  [num_q, B, max(num_bins, 1)]
    `packed` comes from pack_params() (one-time setup repack, not the hot path).
    """
    B = z.shape[0]
    x = jnp.concatenate([z, a], axis=-1).astype(jnp.float32)   # trivial XLA concat
    in_dim = x.shape[1]
    num_q, mlp, nbp = packed["w3"].shape
    nb_out = max(num_bins, 1)

    # Batch tiling: 256-row tiles (MXU M on v6e/v7x) once B is real-sized; the
    # "parallel" grid axis then splits across v7x's two TensorCores.  At B=8 this
    # degenerates to a single step.
    tb = 256 if (B > 256 and B % 256 == 0) else B
    grid = (B // tb,)

    # Whole-array, single-buffered VMEM residents (no auto double-buffering).
    vmem_whole = pl.BlockSpec(memory_space=pltpu.MemorySpace.VMEM)

    out_slab = pl.pallas_call(
        _q_ensemble_kernel,
        out_shape=jax.ShapeDtypeStruct((B, num_q * nbp), jnp.float32),
        grid=grid,
        in_specs=[
            pl.BlockSpec((tb, in_dim), lambda i: (i, 0)),   # x, tiled over batch
            vmem_whole,   # w1 (fused)
            vmem_whole,   # ln1
            vmem_whole,   # w2
            vmem_whole,   # ln2
            vmem_whole,   # w3
            vmem_whole,   # b3
        ],
        out_specs=pl.BlockSpec((tb, num_q * nbp), lambda i: (i, 0)),
        compiler_params=pltpu.CompilerParams(
            dimension_semantics=("parallel",),               # megacore over batch tiles
            vmem_limit_bytes=32 * 1024 * 1024,               # safe on v5e/v6e/v7x
        ),
    )(x, packed["w1"], packed["ln1"], packed["w2"], packed["ln2"],
      packed["w3"], packed["b3"])

    # Layout plumbing outside the kernel: [B, Q*NBP] -> [Q, B, nb_out].
    out = out_slab.reshape(B, num_q, nbp)[:, :, :nb_out]
    return jnp.transpose(out, (1, 0, 2))


# --------------------------- parameter construction ---------------------------

def init_params(key, num_q, in_dim, mlp_dim, num_bins):
    """Deterministic synthetic params, stacked along the ensemble axis
    (mirrors the torch.vmap Ensemble's stacked parameter layout)."""
    ks = jax.random.split(key, 3)

    def lin(k, fan_in, fan_out):
        bound = 1.0 / jnp.sqrt(fan_in)
        kw, kb = jax.random.split(k)
        w = jax.random.uniform(kw, (num_q, fan_in, fan_out), jnp.float32, -bound, bound)
        b = jax.random.uniform(kb, (num_q, 1, fan_out), jnp.float32, -bound, bound)
        return w, b

    w1, b1 = lin(ks[0], in_dim, mlp_dim)
    w2, b2 = lin(ks[1], mlp_dim, mlp_dim)
    w3, b3 = lin(ks[2], mlp_dim, max(num_bins, 1))
    return dict(
        w1=w1, b1=b1,
        g1=jnp.ones((num_q, 1, mlp_dim), jnp.float32),
        bt1=jnp.zeros((num_q, 1, mlp_dim), jnp.float32),
        w2=w2, b2=b2,
        g2=jnp.ones((num_q, 1, mlp_dim), jnp.float32),
        bt2=jnp.zeros((num_q, 1, mlp_dim), jnp.float32),
        w3=w3, b3=b3,
    )


def pack_params(params, num_bins):
    """One-time setup repack into the kernel-friendly layout:
      * W1 fused across the ensemble: [num_q, in, mlp] -> bf16 [in, num_q*mlp],
      * b1/gamma1/beta1 lane-packed into one f32 [3, num_q*mlp] array,
      * b2/gamma2/beta2 coalesced into f32 [num_q, 3, mlp],
      * W3/b3 zero-padded to a 128-multiple lane width; W1/W2/W3 cast to bf16."""
    num_q, in_dim, mlp = params["w1"].shape
    nb = max(num_bins, 1)
    nbp = _round_up(nb, LANE)

    def lane_pack(v):  # [Q, 1, M] -> [1, Q*M]  (member q owns lane strip q)
        return jnp.transpose(v, (1, 0, 2)).reshape(1, num_q * mlp)

    w1_all = jnp.transpose(params["w1"], (1, 0, 2)).reshape(in_dim, num_q * mlp)
    ln1 = jnp.concatenate([lane_pack(params["b1"]),
                           lane_pack(params["g1"]),
                           lane_pack(params["bt1"])], axis=0)                  # [3, Q*M]
    ln2 = jnp.concatenate([params["b2"], params["g2"], params["bt2"]], axis=1)  # [Q, 3, M]

    w3_pad = jnp.zeros((num_q, mlp, nbp), jnp.float32).at[:, :, :nb].set(params["w3"])
    b3_pad = jnp.zeros((num_q, 1, nbp), jnp.float32).at[:, :, :nb].set(params["b3"])

    return dict(
        w1=w1_all.astype(jnp.bfloat16),
        ln1=ln1.astype(jnp.float32),
        w2=params["w2"].astype(jnp.bfloat16),
        ln2=ln2.astype(jnp.float32),
        w3=w3_pad.astype(jnp.bfloat16),
        b3=b3_pad.astype(jnp.float32),
    )


# ------------------------------ pure-JAX reference ----------------------------

def _reference(a, z, params):
    """Canonical (torch-style) formulation with the same dtype policy as the
    kernel: bf16 MXU operands, f32 accumulation and elementwise math."""
    x = jnp.concatenate([z, a], axis=-1).astype(jnp.float32)

    def mm(u, w):
        return jnp.dot(u.astype(jnp.bfloat16), w.astype(jnp.bfloat16),
                       preferred_element_type=jnp.float32)

    def mish(h):
        return h * jnp.tanh(jax.nn.softplus(h))

    def ln(h, g, b):
        mu = h.mean(-1, keepdims=True)
        var = ((h - mu) ** 2).mean(-1, keepdims=True)
        return (h - mu) / jnp.sqrt(var + 1e-5) * g + b

    def one_member(w1, b1, g1, bt1, w2, b2, g2, bt2, w3, b3):
        h = mish(ln(mm(x, w1) + b1, g1, bt1))
        h = mish(ln(mm(h, w2) + b2, g2, bt2))
        return mm(h, w3) + b3

    return jax.vmap(one_member)(
        params["w1"], params["b1"], params["g1"], params["bt1"],
        params["w2"], params["b2"], params["g2"], params["bt2"],
        params["w3"], params["b3"])


# ------------------------------------ main ------------------------------------

if __name__ == "__main__":
    # Small config consistent with the module's __init__.
    latent_dim, action_dim = 24, 8           # in_dim = 32
    mlp_dim, num_q, num_bins = 32, 2, 16
    B = 8
    # dropout / tau / v_min / v_max only affect training or the two-hot decode
    # paths; the return_type='all' forward uses neither.

    key = jax.random.PRNGKey(0)
    k_a, k_z, k_p = jax.random.split(key, 3)
    a = jax.random.normal(k_a, (B, action_dim), jnp.float32)
    z = jax.random.normal(k_z, (B, latent_dim), jnp.float32)

    params = init_params(k_p, num_q, latent_dim + action_dim, mlp_dim, num_bins)
    packed = pack_params(params, num_bins)    # one-time setup repack (not hot path)

    out = q_function_forward(a, z, packed, num_bins=num_bins)
    out = jax.block_until_ready(out)

    ref = _reference(a, z, params)
    assert out.shape == (num_q, B, num_bins)
    # Reference uses the same bf16-MXU / f32-elementwise policy as the kernel, so
    # remaining differences are only the LN (sum/sum-sq) and Mish (1-exp) rewrites
    # plus accumulation order -- a wiring bug would show up as O(1) errors.
    assert jnp.allclose(out, ref, atol=2e-3, rtol=2e-3), "mismatch vs reference"

    print("KERNEL_OK")
</pallas_src>

<mosaic_0001>
module attributes {stable_mosaic.version = 11 : i64} {
  func.func @_q_ensemble_kernel(%arg0: i32, %arg1: memref<8x32xf32, #tpu.memory_space<vmem>>, %arg2: memref<32x64xbf16, #tpu.memory_space<vmem>>, %arg3: memref<3x64xf32, #tpu.memory_space<vmem>>, %arg4: memref<2x32x32xbf16, #tpu.memory_space<vmem>>, %arg5: memref<2x3x32xf32, #tpu.memory_space<vmem>>, %arg6: memref<2x32x128xbf16, #tpu.memory_space<vmem>>, %arg7: memref<2x1x128xf32, #tpu.memory_space<vmem>>, %arg8: memref<8x256xf32, #tpu.memory_space<vmem>>) attributes {dimension_semantics = [#tpu.dimension_semantics<parallel>], iteration_bounds = array<i64: 1>, scalar_prefetch = 0 : i64, scratch_operands = 0 : i64, tpu.core_type = #tpu.core_type<tc>, window_params = [{transform_indices = @transform_0, window_bounds = array<i64: 8, 32>}, {pipeline_mode = #tpu.pipeline_mode<synchronous>, transform_indices = @transform_1, window_bounds = array<i64: 32, 64>}, {pipeline_mode = #tpu.pipeline_mode<synchronous>, transform_indices = @transform_2, window_bounds = array<i64: 3, 64>}, {pipeline_mode = #tpu.pipeline_mode<synchronous>, transform_indices = @transform_3, window_bounds = array<i64: 2, 32, 32>}, {pipeline_mode = #tpu.pipeline_mode<synchronous>, transform_indices = @transform_4, window_bounds = array<i64: 2, 3, 32>}, {pipeline_mode = #tpu.pipeline_mode<synchronous>, transform_indices = @transform_5, window_bounds = array<i64: 2, 32, 128>}, {pipeline_mode = #tpu.pipeline_mode<synchronous>, transform_indices = @transform_6, window_bounds = array<i64: 2, 1, 128>}, {transform_indices = @transform_7, window_bounds = array<i64: 8, 256>}]} {
    %c0 = arith.constant 0 : index
    %c0_0 = arith.constant 0 : index
    %0 = vector.load %arg1[%c0, %c0_0] : memref<8x32xf32, #tpu.memory_space<vmem>>, vector<8x32xf32>
    %1 = arith.truncf %0 : vector<8x32xf32> to vector<8x32xbf16>
    %c0_1 = arith.constant 0 : index
    %c0_2 = arith.constant 0 : index
    %2 = vector.load %arg2[%c0_1, %c0_2] : memref<32x64xbf16, #tpu.memory_space<vmem>>, vector<32x64xbf16>
    %cst = arith.constant dense<0.000000e+00> : vector<8x64xf32>
    %3 = tpu.matmul %1, %2, %cst {dimension_numbers = #tpu.dot_dimension_numbers<[1], [0], [0], [1], [0, 0, 1, 1], [], []>} : vector<8x32xbf16>, vector<32x64xbf16>, vector<8x64xf32> -> vector<8x64xf32>
    %c0_3 = arith.constant 0 : index
    %c0_4 = arith.constant 0 : index
    %4 = vector.load %arg3[%c0_3, %c0_4] : memref<3x64xf32, #tpu.memory_space<vmem>>, vector<1x64xf32>
    %5 = vector.broadcast %4 : vector<1x64xf32> to vector<8x64xf32>
    %6 = arith.addf %3, %5 : vector<8x64xf32>
    %7 = vector.extract_strided_slice %6 {offsets = [0, 0], sizes = [8, 32], strides = [1, 1]} : vector<8x64xf32> to vector<8x32xf32>
    %c1 = arith.constant 1 : index
    %c0_5 = arith.constant 0 : index
    %8 = vector.load %arg3[%c1, %c0_5] : memref<3x64xf32, #tpu.memory_space<vmem>>, vector<1x32xf32>
    %c2 = arith.constant 2 : index
    %c0_6 = arith.constant 0 : index
    %9 = vector.load %arg3[%c2, %c0_6] : memref<3x64xf32, #tpu.memory_space<vmem>>, vector<1x32xf32>
    %cst_7 = arith.constant dense<0.000000e+00> : vector<8xf32>
    %10 = vector.multi_reduction <add>, %7, %cst_7 [1] : vector<8x32xf32> to vector<8xf32>
    %11 = vector.shape_cast %10 : vector<8xf32> to vector<8x1xf32>
    %cst_8 = arith.constant 3.125000e-02 : f32
    %12 = vector.broadcast %cst_8 : f32 to vector<8x1xf32>
    %13 = arith.mulf %11, %12 : vector<8x1xf32>
    %14 = arith.mulf %7, %7 : vector<8x32xf32>
    %cst_9 = arith.constant dense<0.000000e+00> : vector<8xf32>
    %15 = vector.multi_reduction <add>, %14, %cst_9 [1] : vector<8x32xf32> to vector<8xf32>
    %16 = vector.shape_cast %15 : vector<8xf32> to vector<8x1xf32>
    %cst_10 = arith.constant 3.125000e-02 : f32
    %17 = vector.broadcast %cst_10 : f32 to vector<8x1xf32>
    %18 = arith.mulf %16, %17 : vector<8x1xf32>
    %19 = arith.mulf %13, %13 : vector<8x1xf32>
    %20 = arith.subf %18, %19 : vector<8x1xf32>
    %cst_11 = arith.constant 9.99999974E-6 : f32
    %21 = vector.broadcast %cst_11 : f32 to vector<8x1xf32>
    %22 = arith.addf %20, %21 : vector<8x1xf32>
    %23 = math.rsqrt %22 : vector<8x1xf32>
    %24 = vector.broadcast %8 : vector<1x32xf32> to vector<8x32xf32>
    %25 = vector.broadcast %23 : vector<8x1xf32> to vector<8x32xf32>
    %26 = arith.mulf %24, %25 : vector<8x32xf32>
    %27 = vector.broadcast %13 : vector<8x1xf32> to vector<8x32xf32>
    %28 = arith.subf %7, %27 : vector<8x32xf32>
    %29 = arith.mulf %28, %26 : vector<8x32xf32>
    %30 = vector.broadcast %9 : vector<1x32xf32> to vector<8x32xf32>
    %31 = arith.addf %29, %30 : vector<8x32xf32>
    %cst_12 = arith.constant 2.000000e+01 : f32
    %32 = vector.broadcast %cst_12 : f32 to vector<8x32xf32>
    %33 = arith.minimumf %31, %32 : vector<8x32xf32>
    %34 = math.exp %33 : vector<8x32xf32>
    %cst_13 = arith.constant 2.000000e+00 : f32
    %35 = vector.broadcast %cst_13 : f32 to vector<8x32xf32>
    %36 = arith.addf %34, %35 : vector<8x32xf32>
    %37 = arith.mulf %34, %36 : vector<8x32xf32>
    %cst_14 = arith.constant 2.000000e+00 : f32
    %38 = vector.broadcast %cst_14 : f32 to vector<8x32xf32>
    %39 = arith.addf %37, %38 : vector<8x32xf32>
    %40 = arith.divf %37, %39 : vector<8x32xf32>
    %41 = arith.mulf %31, %40 : vector<8x32xf32>
    %42 = arith.truncf %41 : vector<8x32xf32> to vector<8x32xbf16>
    %c0_15 = arith.constant 0 : index
    %c0_16 = arith.constant 0 : index
    %c0_17 = arith.constant 0 : index
    %43 = vector.load %arg4[%c0_15, %c0_16, %c0_17] : memref<2x32x32xbf16, #tpu.memory_space<vmem>>, vector<1x32x32xbf16>
    %44 = vector.shape_cast %43 : vector<1x32x32xbf16> to vector<32x32xbf16>
    %cst_18 = arith.constant dense<0.000000e+00> : vector<8x32xf32>
    %45 = tpu.matmul %42, %44, %cst_18 {dimension_numbers = #tpu.dot_dimension_numbers<[1], [0], [0], [1], [0, 0, 1, 1], [], []>} : vector<8x32xbf16>, vector<32x32xbf16>, vector<8x32xf32> -> vector<8x32xf32>
    %c0_19 = arith.constant 0 : index
    %c0_20 = arith.constant 0 : index
    %c0_21 = arith.constant 0 : index
    %46 = vector.load %arg5[%c0_19, %c0_20, %c0_21] : memref<2x3x32xf32, #tpu.memory_space<vmem>>, vector<1x1x32xf32>
    %47 = vector.shape_cast %46 : vector<1x1x32xf32> to vector<1x32xf32>
    %48 = vector.broadcast %47 : vector<1x32xf32> to vector<8x32xf32>
    %49 = arith.addf %45, %48 : vector<8x32xf32>
    %c0_22 = arith.constant 0 : index
    %c1_23 = arith.constant 1 : index
    %c0_24 = arith.constant 0 : index
    %50 = vector.load %arg5[%c0_22, %c1_23, %c0_24] : memref<2x3x32xf32, #tpu.memory_space<vmem>>, vector<1x1x32xf32>
    %51 = vector.shape_cast %50 : vector<1x1x32xf32> to vector<1x32xf32>
    %c0_25 = arith.constant 0 : index
    %c2_26 = arith.constant 2 : index
    %c0_27 = arith.constant 0 : index
    %52 = vector.load %arg5[%c0_25, %c2_26, %c0_27] : memref<2x3x32xf32, #tpu.memory_space<vmem>>, vector<1x1x32xf32>
    %53 = vector.shape_cast %52 : vector<1x1x32xf32> to vector<1x32xf32>
    %cst_28 = arith.constant dense<0.000000e+00> : vector<8xf32>
    %54 = vector.multi_reduction <add>, %49, %cst_28 [1] : vector<8x32xf32> to vector<8xf32>
    %55 = vector.shape_cast %54 : vector<8xf32> to vector<8x1xf32>
    %cst_29 = arith.constant 3.125000e-02 : f32
    %56 = vector.broadcast %cst_29 : f32 to vector<8x1xf32>
    %57 = arith.mulf %55, %56 : vector<8x1xf32>
    %58 = arith.mulf %49, %49 : vector<8x32xf32>
    %cst_30 = arith.constant dense<0.000000e+00> : vector<8xf32>
    %59 = vector.multi_reduction <add>, %58, %cst_30 [1] : vector<8x32xf32> to vector<8xf32>
    %60 = vector.shape_cast %59 : vector<8xf32> to vector<8x1xf32>
    %cst_31 = arith.constant 3.125000e-02 : f32
    %61 = vector.broadcast %cst_31 : f32 to vector<8x1xf32>
    %62 = arith.mulf %60, %61 : vector<8x1xf32>
    %63 = arith.mulf %57, %57 : vector<8x1xf32>
    %64 = arith.subf %62, %63 : vector<8x1xf32>
    %cst_32 = arith.constant 9.99999974E-6 : f32
    %65 = vector.broadcast %cst_32 : f32 to vector<8x1xf32>
    %66 = arith.addf %64, %65 : vector<8x1xf32>
    %67 = math.rsqrt %66 : vector<8x1xf32>
    %68 = vector.broadcast %51 : vector<1x32xf32> to vector<8x32xf32>
    %69 = vector.broadcast %67 : vector<8x1xf32> to vector<8x32xf32>
    %70 = arith.mulf %68, %69 : vector<8x32xf32>
    %71 = vector.broadcast %57 : vector<8x1xf32> to vector<8x32xf32>
    %72 = arith.subf %49, %71 : vector<8x32xf32>
    %73 = arith.mulf %72, %70 : vector<8x32xf32>
    %74 = vector.broadcast %53 : vector<1x32xf32> to vector<8x32xf32>
    %75 = arith.addf %73, %74 : vector<8x32xf32>
    %cst_33 = arith.constant 2.000000e+01 : f32
    %76 = vector.broadcast %cst_33 : f32 to vector<8x32xf32>
    %77 = arith.minimumf %75, %76 : vector<8x32xf32>
    %78 = math.exp %77 : vector<8x32xf32>
    %cst_34 = arith.constant 2.000000e+00 : f32
    %79 = vector.broadcast %cst_34 : f32 to vector<8x32xf32>
    %80 = arith.addf %78, %79 : vector<8x32xf32>
    %81 = arith.mulf %78, %80 : vector<8x32xf32>
    %cst_35 = arith.constant 2.000000e+00 : f32
    %82 = vector.broadcast %cst_35 : f32 to vector<8x32xf32>
    %83 = arith.addf %81, %82 : vector<8x32xf32>
    %84 = arith.divf %81, %83 : vector<8x32xf32>
    %85 = arith.mulf %75, %84 : vector<8x32xf32>
    %86 = arith.truncf %85 : vector<8x32xf32> to vector<8x32xbf16>
    %c0_36 = arith.constant 0 : index
    %c0_37 = arith.constant 0 : index
    %c0_38 = arith.constant 0 : index
    %87 = vector.load %arg6[%c0_36, %c0_37, %c0_38] : memref<2x32x128xbf16, #tpu.memory_space<vmem>>, vector<1x32x128xbf16>
    %88 = vector.shape_cast %87 : vector<1x32x128xbf16> to vector<32x128xbf16>
    %cst_39 = arith.constant dense<0.000000e+00> : vector<8x128xf32>
    %89 = tpu.matmul %86, %88, %cst_39 {dimension_numbers = #tpu.dot_dimension_numbers<[1], [0], [0], [1], [0, 0, 1, 1], [], []>} : vector<8x32xbf16>, vector<32x128xbf16>, vector<8x128xf32> -> vector<8x128xf32>
    %c0_40 = arith.constant 0 : index
    %c0_41 = arith.constant 0 : index
    %c0_42 = arith.constant 0 : index
    %90 = vector.load %arg7[%c0_40, %c0_41, %c0_42] : memref<2x1x128xf32, #tpu.memory_space<vmem>>, vector<1x1x128xf32>
    %91 = vector.shape_cast %90 : vector<1x1x128xf32> to vector<1x128xf32>
    %92 = vector.broadcast %91 : vector<1x128xf32> to vector<8x128xf32>
    %93 = arith.addf %89, %92 : vector<8x128xf32>
    %c0_43 = arith.constant 0 : index
    %c0_44 = arith.constant 0 : index
    %94 = vector.load %arg8[%c0_43, %c0_44] : memref<8x256xf32, #tpu.memory_space<vmem>>, vector<8x128xf32>
    tpu.vector_store %arg8[%c0_43, %c0_44], %93 {strides = array<i32>} : memref<8x256xf32, #tpu.memory_space<vmem>>, vector<8x128xf32>,
    %95 = vector.extract_strided_slice %6 {offsets = [0, 32], sizes = [8, 32], strides = [1, 1]} : vector<8x64xf32> to vector<8x32xf32>
    %c1_45 = arith.constant 1 : index
    %c32 = arith.constant 32 : index
    %96 = vector.load %arg3[%c1_45, %c32] : memref<3x64xf32, #tpu.memory_space<vmem>>, vector<1x32xf32>
    %c2_46 = arith.constant 2 : index
    %c32_47 = arith.constant 32 : index
    %97 = vector.load %arg3[%c2_46, %c32_47] : memref<3x64xf32, #tpu.memory_space<vmem>>, vector<1x32xf32>
    %cst_48 = arith.constant dense<0.000000e+00> : vector<8xf32>
    %98 = vector.multi_reduction <add>, %95, %cst_48 [1] : vector<8x32xf32> to vector<8xf32>
    %99 = vector.shape_cast %98 : vector<8xf32> to vector<8x1xf32>
    %cst_49 = arith.constant 3.125000e-02 : f32
    %100 = vector.broadcast %cst_49 : f32 to vector<8x1xf32>
    %101 = arith.mulf %99, %100 : vector<8x1xf32>
    %102 = arith.mulf %95, %95 : vector<8x32xf32>
    %cst_50 = arith.constant dense<0.000000e+00> : vector<8xf32>
    %103 = vector.multi_reduction <add>, %102, %cst_50 [1] : vector<8x32xf32> to vector<8xf32>
    %104 = vector.shape_cast %103 : vector<8xf32> to vector<8x1xf32>
    %cst_51 = arith.constant 3.125000e-02 : f32
    %105 = vector.broadcast %cst_51 : f32 to vector<8x1xf32>
    %106 = arith.mulf %104, %105 : vector<8x1xf32>
    %107 = arith.mulf %101, %101 : vector<8x1xf32>
    %108 = arith.subf %106, %107 : vector<8x1xf32>
    %cst_52 = arith.constant 9.99999974E-6 : f32
    %109 = vector.broadcast %cst_52 : f32 to vector<8x1xf32>
    %110 = arith.addf %108, %109 : vector<8x1xf32>
    %111 = math.rsqrt %110 : vector<8x1xf32>
    %112 = vector.broadcast %96 : vector<1x32xf32> to vector<8x32xf32>
    %113 = vector.broadcast %111 : vector<8x1xf32> to vector<8x32xf32>
    %114 = arith.mulf %112, %113 : vector<8x32xf32>
    %115 = vector.broadcast %101 : vector<8x1xf32> to vector<8x32xf32>
    %116 = arith.subf %95, %115 : vector<8x32xf32>
    %117 = arith.mulf %116, %114 : vector<8x32xf32>
    %118 = vector.broadcast %97 : vector<1x32xf32> to vector<8x32xf32>
    %119 = arith.addf %117, %118 : vector<8x32xf32>
    %cst_53 = arith.constant 2.000000e+01 : f32
    %120 = vector.broadcast %cst_53 : f32 to vector<8x32xf32>
    %121 = arith.minimumf %119, %120 : vector<8x32xf32>
    %122 = math.exp %121 : vector<8x32xf32>
    %cst_54 = arith.constant 2.000000e+00 : f32
    %123 = vector.broadcast %cst_54 : f32 to vector<8x32xf32>
    %124 = arith.addf %122, %123 : vector<8x32xf32>
    %125 = arith.mulf %122, %124 : vector<8x32xf32>
    %cst_55 = arith.constant 2.000000e+00 : f32
    %126 = vector.broadcast %cst_55 : f32 to vector<8x32xf32>
    %127 = arith.addf %125, %126 : vector<8x32xf32>
    %128 = arith.divf %125, %127 : vector<8x32xf32>
    %129 = arith.mulf %119, %128 : vector<8x32xf32>
    %130 = arith.truncf %129 : vector<8x32xf32> to vector<8x32xbf16>
    %c1_56 = arith.constant 1 : index
    %c0_57 = arith.constant 0 : index
    %c0_58 = arith.constant 0 : index
    %131 = vector.load %arg4[%c1_56, %c0_57, %c0_58] : memref<2x32x32xbf16, #tpu.memory_space<vmem>>, vector<1x32x32xbf16>
    %132 = vector.shape_cast %131 : vector<1x32x32xbf16> to vector<32x32xbf16>
    %cst_59 = arith.constant dense<0.000000e+00> : vector<8x32xf32>
    %133 = tpu.matmul %130, %132, %cst_59 {dimension_numbers = #tpu.dot_dimension_numbers<[1], [0], [0], [1], [0, 0, 1, 1], [], []>} : vector<8x32xbf16>, vector<32x32xbf16>, vector<8x32xf32> -> vector<8x32xf32>
    %c1_60 = arith.constant 1 : index
    %c0_61 = arith.constant 0 : index
    %c0_62 = arith.constant 0 : index
    %134 = vector.load %arg5[%c1_60, %c0_61, %c0_62] : memref<2x3x32xf32, #tpu.memory_space<vmem>>, vector<1x1x32xf32>
    %135 = vector.shape_cast %134 : vector<1x1x32xf32> to vector<1x32xf32>
    %136 = vector.broadcast %135 : vector<1x32xf32> to vector<8x32xf32>
    %137 = arith.addf %133, %136 : vector<8x32xf32>
    %c1_63 = arith.constant 1 : index
    %c1_64 = arith.constant 1 : index
    %c0_65 = arith.constant 0 : index
    %138 = vector.load %arg5[%c1_63, %c1_64, %c0_65] : memref<2x3x32xf32, #tpu.memory_space<vmem>>, vector<1x1x32xf32>
    %139 = vector.shape_cast %138 : vector<1x1x32xf32> to vector<1x32xf32>
    %c1_66 = arith.constant 1 : index
    %c2_67 = arith.constant 2 : index
    %c0_68 = arith.constant 0 : index
    %140 = vector.load %arg5[%c1_66, %c2_67, %c0_68] : memref<2x3x32xf32, #tpu.memory_space<vmem>>, vector<1x1x32xf32>
    %141 = vector.shape_cast %140 : vector<1x1x32xf32> to vector<1x32xf32>
    %cst_69 = arith.constant dense<0.000000e+00> : vector<8xf32>
    %142 = vector.multi_reduction <add>, %137, %cst_69 [1] : vector<8x32xf32> to vector<8xf32>
    %143 = vector.shape_cast %142 : vector<8xf32> to vector<8x1xf32>
    %cst_70 = arith.constant 3.125000e-02 : f32
    %144 = vector.broadcast %cst_70 : f32 to vector<8x1xf32>
    %145 = arith.mulf %143, %144 : vector<8x1xf32>
    %146 = arith.mulf %137, %137 : vector<8x32xf32>
    %cst_71 = arith.constant dense<0.000000e+00> : vector<8xf32>
    %147 = vector.multi_reduction <add>, %146, %cst_71 [1] : vector<8x32xf32> to vector<8xf32>
    %148 = vector.shape_cast %147 : vector<8xf32> to vector<8x1xf32>
    %cst_72 = arith.constant 3.125000e-02 : f32
    %149 = vector.broadcast %cst_72 : f32 to vector<8x1xf32>
    %150 = arith.mulf %148, %149 : vector<8x1xf32>
    %151 = arith.mulf %145, %145 : vector<8x1xf32>
    %152 = arith.subf %150, %151 : vector<8x1xf32>
    %cst_73 = arith.constant 9.99999974E-6 : f32
    %153 = vector.broadcast %cst_73 : f32 to vector<8x1xf32>
    %154 = arith.addf %152, %153 : vector<8x1xf32>
    %155 = math.rsqrt %154 : vector<8x1xf32>
    %156 = vector.broadcast %139 : vector<1x32xf32> to vector<8x32xf32>
    %157 = vector.broadcast %155 : vector<8x1xf32> to vector<8x32xf32>
    %158 = arith.mulf %156, %157 : vector<8x32xf32>
    %159 = vector.broadcast %145 : vector<8x1xf32> to vector<8x32xf32>
    %160 = arith.subf %137, %159 : vector<8x32xf32>
    %161 = arith.mulf %160, %158 : vector<8x32xf32>
    %162 = vector.broadcast %141 : vector<1x32xf32> to vector<8x32xf32>
    %163 = arith.addf %161, %162 : vector<8x32xf32>
    %cst_74 = arith.constant 2.000000e+01 : f32
    %164 = vector.broadcast %cst_74 : f32 to vector<8x32xf32>
    %165 = arith.minimumf %163, %164 : vector<8x32xf32>
    %166 = math.exp %165 : vector<8x32xf32>
    %cst_75 = arith.constant 2.000000e+00 : f32
    %167 = vector.broadcast %cst_75 : f32 to vector<8x32xf32>
    %168 = arith.addf %166, %167 : vector<8x32xf32>
    %169 = arith.mulf %166, %168 : vector<8x32xf32>
    %cst_76 = arith.constant 2.000000e+00 : f32
    %170 = vector.broadcast %cst_76 : f32 to vector<8x32xf32>
    %171 = arith.addf %169, %170 : vector<8x32xf32>
    %172 = arith.divf %169, %171 : vector<8x32xf32>
    %173 = arith.mulf %163, %172 : vector<8x32xf32>
    %174 = arith.truncf %173 : vector<8x32xf32> to vector<8x32xbf16>
    %c1_77 = arith.constant 1 : index
    %c0_78 = arith.constant 0 : index
    %c0_79 = arith.constant 0 : index
    %175 = vector.load %arg6[%c1_77, %c0_78, %c0_79] : memref<2x32x128xbf16, #tpu.memory_space<vmem>>, vector<1x32x128xbf16>
    %176 = vector.shape_cast %175 : vector<1x32x128xbf16> to vector<32x128xbf16>
    %cst_80 = arith.constant dense<0.000000e+00> : vector<8x128xf32>
    %177 = tpu.matmul %174, %176, %cst_80 {dimension_numbers = #tpu.dot_dimension_numbers<[1], [0], [0], [1], [0, 0, 1, 1], [], []>} : vector<8x32xbf16>, vector<32x128xbf16>, vector<8x128xf32> -> vector<8x128xf32>
    %c1_81 = arith.constant 1 : index
    %c0_82 = arith.constant 0 : index
    %c0_83 = arith.constant 0 : index
    %178 = vector.load %arg7[%c1_81, %c0_82, %c0_83] : memref<2x1x128xf32, #tpu.memory_space<vmem>>, vector<1x1x128xf32>
    %179 = vector.shape_cast %178 : vector<1x1x128xf32> to vector<1x128xf32>
    %180 = vector.broadcast %179 : vector<1x128xf32> to vector<8x128xf32>
    %181 = arith.addf %177, %180 : vector<8x128xf32>
    %c0_84 = arith.constant 0 : index
    %c128 = arith.constant 128 : index
    %182 = vector.load %arg8[%c0_84, %c128] : memref<8x256xf32, #tpu.memory_space<vmem>>, vector<8x128xf32>
    tpu.vector_store %arg8[%c0_84, %c128], %181 {strides = array<i32>} : memref<8x256xf32, #tpu.memory_space<vmem>>, vector<8x128xf32>,
    return
  }
  func.func @transform_0(%arg0: i32) -> (i32, i32) {
    %c0_i32 = arith.constant 0 : i32
    %c0_i32_0 = arith.constant 0 : i32
    return %arg0, %c0_i32 : i32, i32
  }
  func.func @transform_1(%arg0: i32) -> (i32, i32) {
    %c0_i32 = arith.constant 0 : i32
    %c0_i32_0 = arith.constant 0 : i32
    %c0_i32_1 = arith.constant 0 : i32
    return %c0_i32, %c0_i32_0 : i32, i32
  }
  func.func @transform_2(%arg0: i32) -> (i32, i32) {
    %c0_i32 = arith.constant 0 : i32
    %c0_i32_0 = arith.constant 0 : i32
    %c0_i32_1 = arith.constant 0 : i32
    return %c0_i32, %c0_i32_0 : i32, i32
  }
  func.func @transform_3(%arg0: i32) -> (i32, i32, i32) {
    %c0_i32 = arith.constant 0 : i32
    %c0_i32_0 = arith.constant 0 : i32
    %c0_i32_1 = arith.constant 0 : i32
    %c0_i32_2 = arith.constant 0 : i32
    return %c0_i32, %c0_i32_0, %c0_i32_1 : i32, i32, i32
  }
  func.func @transform_4(%arg0: i32) -> (i32, i32, i32) {
    %c0_i32 = arith.constant 0 : i32
    %c0_i32_0 = arith.constant 0 : i32
    %c0_i32_1 = arith.constant 0 : i32
    %c0_i32_2 = arith.constant 0 : i32
    return %c0_i32, %c0_i32_0, %c0_i32_1 : i32, i32, i32
  }
  func.func @transform_5(%arg0: i32) -> (i32, i32, i32) {
    %c0_i32 = arith.constant 0 : i32
    %c0_i32_0 = arith.constant 0 : i32
    %c0_i32_1 = arith.constant 0 : i32
    %c0_i32_2 = arith.constant 0 : i32
    return %c0_i32, %c0_i32_0, %c0_i32_1 : i32, i32, i32
  }
  func.func @transform_6(%arg0: i32) -> (i32, i32, i32) {
    %c0_i32 = arith.constant 0 : i32
    %c0_i32_0 = arith.constant 0 : i32
    %c0_i32_1 = arith.constant 0 : i32
    %c0_i32_2 = arith.constant 0 : i32
    return %c0_i32, %c0_i32_0, %c0_i32_1 : i32, i32, i32
  }
  func.func @transform_7(%arg0: i32) -> (i32, i32) {
    %c0_i32 = arith.constant 0 : i32
    %c0_i32_0 = arith.constant 0 : i32
    return %arg0, %c0_i32 : i32, i32
  }
}

</mosaic_0001>

<bundles_post_ra>
// kernel: tpu_custom_call.1
= control target key start
LH: loop header
LB: loop body
LE: loop exit
PB: predicated region body
PF: predicated region fallthrough
CT: control target
= control target key end

     0   :  { %12 = vsyncpa [#allocation3], 0  ;;  %s828_s0 = inlined_call_operand.vmem [shape: f32[8,32], index: 0, kind: input, shape index: {}]   ;;  %s829_s1 = inlined_call_operand.hbm [shape: bf16[32,64], index: 1, kind: input, shape index: {}]   ;;  %s830_s2 = inlined_call_operand.vmem [shape: f32[3,64], index: 2, kind: input, shape index: {}]   ;;  %s831_s3 = inlined_call_operand.hbm [shape: bf16[2,32,32], index: 3, kind: input, shape index: {}]   ;;  %s832_s4 = inlined_call_operand.vmem [shape: f32[2,3,32], index: 4, kind: input, shape index: {}]   ;;  %s833_s5 = inlined_call_operand.hbm [shape: bf16[2,32,128], index: 5, kind: input, shape index: {}]   ;;  %s834_s6 = inlined_call_operand.vmem [shape: f32[2,1,128], index: 6, kind: input, shape index: {}]   ;;  %s835_s7 = inlined_call_operand.hbm [shape: f32[8,256], index: 7, kind: output, shape index: {}]  }
   0x1   :  { %13 = vsyncpa [#allocation6], 0 }
   0x2   :  { %14 = vsyncpa [#allocation4], 0  ;;  %s36_s26 = sshll.u32 %s831_s3, 4  ;;  %s703_s27 = smov [#allocation5]   ;;  %s37_s26 = int_to_ptr.hbm [resolvable:$true] %s36_s26 }
   0x3   :  { %s38_s28 = sshll.u32 %s703_s27, 4  ;;  %s21_s8 = sshll.u32 %s829_s1, 4  ;;  %s39_s28 = int_to_ptr.vmem [resolvable:$true] %s38_s28  ;;  %s22_s8 = int_to_ptr.hbm [resolvable:$true] %s21_s8 }
   0x4   :  { %s704_s9 = smov 64   ;;  %s705_s10 = smov 4  }
   0x5   :  { %44 = dma.hbm_to_vmem [thread:$0]  %s37_s26, 512, %s39_s28, [#allocation6], %s704_s9, %s704_s9, %s705_s10  }
   0x6   :  { %s706_s11 = smov [#allocation2]   ;;  %s51_s15 = sshll.u32 %s833_s5, 4  ;;  %s52_s15 = int_to_ptr.hbm [resolvable:$true] %s51_s15 }
   0x7   :  { %s23_s12 = sshll.u32 %s706_s11, 4  ;;  %s707_s3 = smov [#allocation7]   ;;  %s24_s12 = int_to_ptr.vmem [resolvable:$true] %s23_s12 }
   0x8   :  { %29 = dma.hbm_to_vmem [thread:$0]  %s22_s8, 256, %s24_s12, [#allocation3], %s704_s9, %s704_s9, %s705_s10  }
   0x9   :  { %s53_s16 = sshll.u32 %s707_s3, 4  ;;  %s54_s16 = int_to_ptr.vmem [resolvable:$true] %s53_s16 }
   0xa   :  { %59 = dma.hbm_to_vmem [thread:$0]  %s52_s15, 512, %s54_s16, [#allocation6], %s704_s9, %s704_s9, %s705_s10  }
   0xb   :  { %697 = dma.done.wait [#allocation3], 256  }
   0xc   :  { %698 = vsyncadd [#allocation3], 4294967040 }
   0xd   :  { %699 = dma.done.wait [#allocation6], 1024  }
   0xe   :  { %700 = vsyncadd [#allocation6], 4294966272  ;;  %v548_v0 = vld [vmem:[#allocation2 + $0x8] sm:$0xff]  ;;  %v547_v1 = vld [vmem:[#allocation2] sm:$0xff]  ;;  %vm95_vm0 = vcmask 261120   ;;  %s708_s19 = smov 96  }
   0xf   :  { %v75_v2 = vld [vmem:[%s828_s0] sm:$0xff]  ;;  %105 = vmatpush.bf16.msra.mxu0 %v548_v0  ;;  %v550_v14 = vld [vmem:[#allocation5 + $0x8] sm:$0xff]  ;;  %v549_v15 = vld [vmem:[#allocation5] sm:$0xff]  ;;  %s709_s1 = smov [#allocation8]  }
  0x10   :  { %v76_v3 = vpack.c.bf16 %v75_v2, %v75_v2  ;;  %v564_v4 = vld [vmem:[%s830_s2] ss:$0 sm:$0xff]  ;;  %192 = vmatpush.bf16.msra.mxu1 %v550_v14  ;;  %v565_v29 = vld [vmem:[%s830_s2 + $0x1] ss:$0 sm:$0xff]  ;;  %v566_v34 = vld [vmem:[%s830_s2 + $0x2] ss:$0 sm:$0xff] }
  0x11   :  { %s485_s17 = sshll.u32 %s709_s1, 4  ;;  %s486_s17 = int_to_ptr.vmem [resolvable:$true] %s485_s17 }
  0x13   :  { %106 = vmatpush.bf16.msra.mxu0 %v547_v1 }
  0x14   :  { %193 = vmatpush.bf16.msra.mxu1 %v549_v15 }
  0x16   :  { %506 = vmatmul.msk.bf16.vlgmr.msra.gmra.mxu0 %vm95_vm0, %v76_v3 }
  0x93   :  { %v108_v5 = vpop.f32.mrf.mxu0 }
  0x94   :  { %v766_v6 = vadd.f32 %v564_v4, %v108_v5  ;;  %v567_v4 = vld [vmem:[%s830_s2 + $0x1] ss:$0 sm:$0xff] }
  0x96   :  { %292 = vrot.lane.b32.xlu0 %v766_v6, %s708_s19  ;;  %v114_v7 = vsel %vm95_vm0, %v766_v6, 0.0  ;;  %v118_v8 = vmul.f32 %v766_v6, %v766_v6 }
  0x97   :  { %115 = vadd.xlane.f32.xlu2 %v114_v7 }
  0x98   :  { %v119_v10 = vsel %vm95_vm0, %v118_v8, 0.0 }
  0x9b   :  { %v110_v9 = vpop.f32.mrf.mxu0 }
  0x9e   :  { %300 = vrot.lane.b32.xlu0 %v118_v8, %s708_s19 }
  0x9f   :  { %120 = vadd.xlane.f32.xlu2 %v119_v10  ;;  %v568_v10 = vld [vmem:[%s830_s2 + $0x2] ss:$0 sm:$0xff] }
 0x108   :  { %v293_v11 = vpop.permute.xlu0 %292 }
 0x109   :  { %v295_v12 = vsel %vm95_vm0, %v293_v11, 0.0 }
 0x10a   :  { %296 = vadd.xlane.f32.xlu1 %v295_v12  ;;  %v116_v13 = vpop.xlane.xlu2 %115 }
 0x10b   :  { %v117_v16 = vmul.f32 0.03125, %v116_v13 }
 0x10d   :  { %v123_v20 = vmul.f32 %v117_v16, %v117_v16  ;;  %v138_v32 = vsub.f32 %v766_v6, %v117_v16 }
 0x110   :  { %v301_v17 = vpop.permute.xlu0 %300 }
 0x111   :  { %v303_v18 = vsel %vm95_vm0, %v301_v17, 0.0 }
 0x112   :  { %304 = vadd.xlane.f32.xlu1 %v303_v18  ;;  %v121_v19 = vpop.xlane.xlu2 %120 }
 0x113   :  { %v122_v21 = vmul.f32 0.03125, %v121_v19 }
 0x115   :  { %v124_v22 = vsub.f32 %v122_v21, %v123_v20 }
 0x117   :  { %v125_v23 = vadd.f32 1e-05, %v124_v22  ;;  %v554_v22 = vld [vmem:[#allocation5 + $0x18] sm:$0xff] }
 0x118   :  { %381 = vmatpush.bf16.msra.mxu3 %v554_v22 }
 0x119   :  { %577 = vrsqrt.f32 %v125_v23  ;;  %vm132_vm2 = vweird.f32 %v125_v23 }
 0x11f   :  { %v578_v24 = vpop.eup %577 }
 0x120   :  { %v127_v25 = vmul.f32 %v578_v24, %v125_v23  ;;  %vm133_vm1 = vweird.f32 %v578_v24 }
 0x121   :  { %vm134_vm3 = vmor %vm132_vm2, %vm133_vm1 }
 0x122   :  { %v128_v26 = vmul.f32 %v578_v24, %v127_v25  ;;  %v553_v25 = vld [vmem:[#allocation5 + $0x10] sm:$0xff] }
 0x123   :  { %382 = vmatpush.bf16.msra.mxu3 %v553_v25  ;;  %v573_v25 = vld [vmem:[%s834_s6] ss:$0 sm:$0xff] }
 0x124   :  { %v129_v27 = vmul.f32 0.5, %v128_v26 }
 0x126   :  { %v130_v28 = vsub.f32 1.5, %v129_v27 }
 0x128   :  { %v131_v30 = vmul.f32 %v578_v24, %v130_v28 }
 0x12a   :  { %v135_v31 = vsel %vm134_vm3, %v578_v24, %v131_v30 }
 0x12b   :  { %v137_v33 = vmul.f32 %v565_v29, %v135_v31 }
 0x12d   :  { %v139_v35 = vmul.f32 %v138_v32, %v137_v33  ;;  %v569_v33 = vld [vmem:[%s832_s4] ss:$0 sm:$0xff] }
 0x12f   :  { %v141_v36 = vadd.f32 %v566_v34, %v139_v35 }
 0x131   :  { %v142_v37 = vmin.f32 %v141_v36, 20.0 }
 0x133   :  { %v143_v38 = vmul.f32 1.442695, %v142_v37 }
 0x135   :  { %579 = vpow2.f32 %v143_v38 }
 0x13b   :  { %v580_v39 = vpop.eup %579 }
 0x13c   :  { %v145_v40 = vadd.f32 2.0, %v580_v39 }
 0x13e   :  { %v146_v41 = vmul.f32 %v580_v39, %v145_v40 }
 0x140   :  { %v147_v42 = vadd.f32 2.0, %v146_v41 }
 0x142   :  { %581 = vrcp.f32 %v147_v42  ;;  %v159_v46 = vand.u32 2147483648, %v147_v42  ;;  %v157_v48 = vand.u32 2147483647, %v147_v42  ;;  %vm153_vm5 = vweird.f32 %v147_v42 }
 0x144   :  { %v160_v50 = vor.u32 1.1754944e-38, %v159_v46  ;;  %vm158_vm7 = vcmp.eq.f32.partialorder %v157_v48, 8.507059e+37 }
 0x148   :  { %v582_v43 = vpop.eup %581 }
 0x149   :  { %v149_v44 = vmul.f32 %v582_v43, %v147_v42  ;;  %vm154_vm4 = vweird.f32 %v582_v43  ;;  %v551_v42 = vld [vmem:[#allocation7] sm:$0xff] }
 0x14a   :  { %vm155_vm6 = vmor %vm153_vm5, %vm154_vm4 }
 0x14b   :  { %v150_v45 = vsub.f32 1.0, %v149_v44 }
 0x14d   :  { %v151_v47 = vmul.f32 %v582_v43, %v150_v45 }
 0x14f   :  { %v152_v49 = vadd.f32 %v582_v43, %v151_v47 }
 0x151   :  { %v156_v51 = vsel %vm155_vm6, %v582_v43, %v152_v49 }
 0x152   :  { %v161_v52 = vsel %vm158_vm7, %v160_v50, %v156_v51 }
 0x153   :  { %v162_v53 = vmul.f32 %v161_v52, %v146_v41  ;;  %v552_v41 = vld [vmem:[#allocation7 + $0x8] sm:$0xff] }
 0x154   :  { %281 = vmatpush.bf16.msra.mxu2 %v552_v41 }
 0x155   :  { %v163_v54 = vmul.f32 %v162_v53, %v141_v36 }
 0x157   :  { %v164_v55 = vpack.c.bf16 %v163_v54, %v163_v54 }
 0x158   :  { %282 = vmatpush.bf16.msra.mxu2 %v551_v42 }
 0x159   :  { %515 = vmatmul.msk.bf16.vlgmr.msra.gmra.mxu1 %vm95_vm0, %v164_v55  ;;  %v570_v55 = vld [vmem:[%s832_s4 + $0x1] ss:$0 sm:$0xff] }
 0x17d   :  { %v297_v56 = vpop.xlane.xlu1 %296 }
 0x17e   :  { %v298_v57 = vmul.f32 0.03125, %v297_v56 }
 0x180   :  { %v307_v59 = vmul.f32 %v298_v57, %v298_v57  ;;  %v322_v8 = vsub.f32 %v766_v6, %v298_v57 }
 0x185   :  { %v305_v58 = vpop.xlane.xlu1 %304 }
 0x186   :  { %v306_v60 = vmul.f32 0.03125, %v305_v58 }
 0x188   :  { %v308_v61 = vsub.f32 %v306_v60, %v307_v59  ;;  %v571_v60 = vld [vmem:[%s832_s4 + $0x2] ss:$0 sm:$0xff] }
 0x18a   :  { %v309_v62 = vadd.f32 1e-05, %v308_v61 }
 0x18c   :  { %583 = vrsqrt.f32 %v309_v62  ;;  %vm316_vm9 = vweird.f32 %v309_v62 }
 0x192   :  { %v584_v63 = vpop.eup %583 }
 0x193   :  { %v311_v0 = vmul.f32 %v584_v63, %v309_v62  ;;  %vm317_vm8 = vweird.f32 %v584_v63 }
 0x194   :  { %vm318_vm10 = vmor %vm316_vm9, %vm317_vm8 }
 0x195   :  { %v312_v1 = vmul.f32 %v584_v63, %v311_v0 }
 0x197   :  { %v313_v2 = vmul.f32 0.5, %v312_v1 }
 0x199   :  { %v314_v3 = vsub.f32 1.5, %v313_v2 }
 0x19b   :  { %v315_v5 = vmul.f32 %v584_v63, %v314_v3 }
 0x19d   :  { %v319_v7 = vsel %vm318_vm10, %v584_v63, %v315_v5 }
 0x19e   :  { %v321_v9 = vmul.f32 %v567_v4, %v319_v7 }
 0x1a0   :  { %v323_v11 = vmul.f32 %v322_v8, %v321_v9 }
 0x1a2   :  { %v325_v12 = vadd.f32 %v568_v10, %v323_v11 }
 0x1a4   :  { %v326_v13 = vmin.f32 %v325_v12, 20.0 }
 0x1a6   :  { %v327_v14 = vmul.f32 1.442695, %v326_v13 }
 0x1a8   :  { %585 = vpow2.f32 %v327_v14 }
 0x1ae   :  { %v586_v15 = vpop.eup %585 }
 0x1af   :  { %v329_v16 = vadd.f32 2.0, %v586_v15 }
 0x1b1   :  { %v330_v17 = vmul.f32 %v586_v15, %v329_v16 }
 0x1b3   :  { %v331_v18 = vadd.f32 2.0, %v330_v17 }
 0x1b5   :  { %587 = vrcp.f32 %v331_v18  ;;  %v343_v6 = vand.u32 2147483648, %v331_v18  ;;  %v341_v24 = vand.u32 2147483647, %v331_v18  ;;  %vm337_vm12 = vweird.f32 %v331_v18 }
 0x1b7   :  { %v344_v27 = vor.u32 1.1754944e-38, %v343_v6  ;;  %vm342_vm14 = vcmp.eq.f32.partialorder %v341_v24, 8.507059e+37 }
 0x1bb   :  { %v588_v19 = vpop.eup %587 }
 0x1bc   :  { %v333_v20 = vmul.f32 %v588_v19, %v331_v18  ;;  %vm338_vm11 = vweird.f32 %v588_v19 }
 0x1bd   :  { %vm339_vm13 = vmor %vm337_vm12, %vm338_vm11 }
 0x1be   :  { %v334_v21 = vsub.f32 1.0, %v333_v20 }
 0x1c0   :  { %v335_v23 = vmul.f32 %v588_v19, %v334_v21 }
 0x1c2   :  { %v336_v26 = vadd.f32 %v588_v19, %v335_v23 }
 0x1c4   :  { %v340_v28 = vsel %vm339_vm13, %v588_v19, %v336_v26  ;;  %v572_v19 = vld [vmem:[%s832_s4 + $0x4] ss:$0 sm:$0xff] }
 0x1c5   :  { %v345_v29 = vsel %vm342_vm14, %v344_v27, %v340_v28 }
 0x1c6   :  { %v346_v30 = vmul.f32 %v345_v29, %v330_v17  ;;  %v556_v29 = vld [vmem:[#allocation7 + $0x18] sm:$0xff] }
 0x1c7   :  { %472 = vmatpush.bf16.msrb.mxu0 %v556_v29 }
 0x1c8   :  { %v347_v31 = vmul.f32 %v346_v30, %v325_v12  ;;  %v555_v30 = vld [vmem:[#allocation7 + $0x10] sm:$0xff] }
 0x1ca   :  { %v348_v32 = vpack.c.bf16 %v347_v31, %v347_v31 }
 0x1cb   :  { %473 = vmatpush.bf16.msrb.mxu0 %v555_v30 }
 0x1cc   :  { %358 = vrot.lane.b32.xlu0 %v348_v32, %s708_s19  ;;  %s487_s19 = sshll.u32 %s835_s7, 4  ;;  %s488_s19 = int_to_ptr.hbm [resolvable:$true] %s487_s19 }
 0x1d6   :  { %v195_v34 = vpop.f32.mrf.mxu1 }
 0x1d7   :  { %v196_v35 = vadd.f32 %v569_v33, %v195_v34 }
 0x1d9   :  { %v201_v36 = vsel %vm95_vm0, %v196_v35, 0.0  ;;  %v205_v37 = vmul.f32 %v196_v35, %v196_v35 }
 0x1da   :  { %202 = vadd.xlane.f32.xlu1 %v201_v36 }
 0x1db   :  { %v206_v38 = vsel %vm95_vm0, %v205_v37, 0.0 }
 0x1dc   :  { %207 = vadd.xlane.f32.xlu2 %v206_v38 }
 0x1de   :  { %v197_v39 = vpop.f32.mrf.mxu1 }
 0x23e   :  { %v359_v40 = vpop.permute.xlu0 %358 }
 0x23f   :  { %534 = vmatmul.msk.bf16.vlgmr.msra.gmra.mxu3 %vm95_vm0, %v359_v40 }
 0x24d   :  { %v203_v43 = vpop.xlane.xlu1 %202 }
 0x24e   :  { %v204_v44 = vmul.f32 0.03125, %v203_v43  ;;  %v574_v43 = vld [vmem:[%s832_s4 + $0x5] ss:$0 sm:$0xff] }
 0x24f   :  { %v208_v45 = vpop.xlane.xlu2 %207 }
 0x250   :  { %v210_v46 = vmul.f32 %v204_v44, %v204_v44  ;;  %v209_v47 = vmul.f32 0.03125, %v208_v45  ;;  %v225_v58 = vsub.f32 %v196_v35, %v204_v44 }
 0x252   :  { %v211_v48 = vsub.f32 %v209_v47, %v210_v46 }
 0x254   :  { %v212_v49 = vadd.f32 1e-05, %v211_v48  ;;  %v575_v48 = vld [vmem:[%s832_s4 + $0x6] ss:$0 sm:$0xff] }
 0x256   :  { %589 = vrsqrt.f32 %v212_v49  ;;  %vm219_vm1 = vweird.f32 %v212_v49 }
 0x25c   :  { %v590_v50 = vpop.eup %589 }
 0x25d   :  { %v214_v51 = vmul.f32 %v590_v50, %v212_v49  ;;  %vm220_vm15 = vweird.f32 %v590_v50 }
 0x25e   :  { %vm221_vm2 = vmor %vm219_vm1, %vm220_vm15 }
 0x25f   :  { %v215_v52 = vmul.f32 %v590_v50, %v214_v51 }
 0x261   :  { %v216_v53 = vmul.f32 0.5, %v215_v52 }
 0x263   :  { %v217_v54 = vsub.f32 1.5, %v216_v53 }
 0x265   :  { %v218_v56 = vmul.f32 %v590_v50, %v217_v54 }
 0x267   :  { %v222_v57 = vsel %vm221_vm2, %v590_v50, %v218_v56 }
 0x268   :  { %v224_v59 = vmul.f32 %v570_v55, %v222_v57 }
 0x26a   :  { %v226_v61 = vmul.f32 %v225_v58, %v224_v59 }
 0x26c   :  { %v228_v62 = vadd.f32 %v571_v60, %v226_v61 }
 0x26e   :  { %v229_v63 = vmin.f32 %v228_v62, 20.0 }
 0x270   :  { %v230_v0 = vmul.f32 1.442695, %v229_v63 }
 0x272   :  { %591 = vpow2.f32 %v230_v0 }
 0x278   :  { %v592_v1 = vpop.eup %591 }
 0x279   :  { %v232_v2 = vadd.f32 2.0, %v592_v1 }
 0x27b   :  { %v233_v3 = vmul.f32 %v592_v1, %v232_v2 }
 0x27d   :  { %v234_v4 = vadd.f32 2.0, %v233_v3 }
 0x27f   :  { %593 = vrcp.f32 %v234_v4  ;;  %v246_v9 = vand.u32 2147483648, %v234_v4  ;;  %v244_v11 = vand.u32 2147483647, %v234_v4  ;;  %vm240_vm4 = vweird.f32 %v234_v4 }
 0x281   :  { %v247_v13 = vor.u32 1.1754944e-38, %v246_v9  ;;  %vm245_vm6 = vcmp.eq.f32.partialorder %v244_v11, 8.507059e+37 }
 0x285   :  { %v594_v5 = vpop.eup %593 }
 0x286   :  { %v236_v7 = vmul.f32 %v594_v5, %v234_v4  ;;  %vm241_vm3 = vweird.f32 %v594_v5 }
 0x287   :  { %vm242_vm5 = vmor %vm240_vm4, %vm241_vm3 }
 0x288   :  { %v237_v8 = vsub.f32 1.0, %v236_v7  ;;  %v576_v7 = vld [vmem:[%s834_s6 + $0x1] ss:$0 sm:$0xff] }
 0x28a   :  { %v238_v10 = vmul.f32 %v594_v5, %v237_v8 }
 0x28c   :  { %v239_v12 = vadd.f32 %v594_v5, %v238_v10 }
 0x28e   :  { %v243_v14 = vsel %vm242_vm5, %v594_v5, %v239_v12 }
 0x28f   :  { %v248_v15 = vsel %vm245_vm6, %v247_v13, %v243_v14 }
 0x290   :  { %v249_v16 = vmul.f32 %v248_v15, %v233_v3 }
 0x292   :  { %v250_v17 = vmul.f32 %v249_v16, %v228_v62 }
 0x294   :  { %v251_v18 = vpack.c.bf16 %v250_v17, %v250_v17 }
 0x296   :  { %524 = vmatmul.msk.bf16.vlgmr.msra.gmra.mxu2 %vm95_vm0, %v251_v18 }
 0x2c2   :  { %v384_v20 = vpop.f32.mrf.mxu3 }
 0x2c3   :  { %v385_v21 = vadd.f32 %v572_v19, %v384_v20 }
 0x2c5   :  { %v390_v22 = vsel %vm95_vm0, %v385_v21, 0.0  ;;  %v394_v6 = vmul.f32 %v385_v21, %v385_v21 }
 0x2c6   :  { %391 = vadd.xlane.f32.xlu0 %v390_v22 }
 0x2c7   :  { %v395_v23 = vsel %vm95_vm0, %v394_v6, 0.0 }
 0x2c8   :  { %396 = vadd.xlane.f32.xlu1 %v395_v23 }
 0x2ca   :  { %v386_v24 = vpop.f32.mrf.mxu3 }
 0x319   :  { %v284_v26 = vpop.f32.mrf.mxu2 }
 0x31a   :  { %v285_v27 = vadd.f32 %v573_v25, %v284_v26 }
 0x31c   :  { %288 = vst [vmem:[#allocation8] sm:$0xff] %v285_v27 }
 0x321   :  { %v286_v28 = vpop.f32.mrf.mxu2 }
 0x339   :  { %v392_v31 = vpop.xlane.xlu0 %391 }
 0x33a   :  { %v393_v32 = vmul.f32 0.03125, %v392_v31 }
 0x33b   :  { %v397_v33 = vpop.xlane.xlu1 %396 }
 0x33c   :  { %v399_v34 = vmul.f32 %v393_v32, %v393_v32  ;;  %v398_v35 = vmul.f32 0.03125, %v397_v33  ;;  %v414_v46 = vsub.f32 %v385_v21, %v393_v32 }
 0x33e   :  { %v400_v36 = vsub.f32 %v398_v35, %v399_v34 }
 0x340   :  { %v401_v37 = vadd.f32 1e-05, %v400_v36 }
 0x342   :  { %595 = vrsqrt.f32 %v401_v37  ;;  %vm408_vm8 = vweird.f32 %v401_v37 }
 0x348   :  { %v596_v38 = vpop.eup %595 }
 0x349   :  { %v403_v39 = vmul.f32 %v596_v38, %v401_v37  ;;  %vm409_vm7 = vweird.f32 %v596_v38 }
 0x34a   :  { %vm410_vm9 = vmor %vm408_vm8, %vm409_vm7 }
 0x34b   :  { %v404_v40 = vmul.f32 %v596_v38, %v403_v39 }
 0x34d   :  { %v405_v41 = vmul.f32 0.5, %v404_v40 }
 0x34f   :  { %v406_v42 = vsub.f32 1.5, %v405_v41 }
 0x351   :  { %v407_v44 = vmul.f32 %v596_v38, %v406_v42 }
 0x353   :  { %v411_v45 = vsel %vm410_vm9, %v596_v38, %v407_v44 }
 0x354   :  { %v413_v47 = vmul.f32 %v574_v43, %v411_v45 }
 0x356   :  { %v415_v49 = vmul.f32 %v414_v46, %v413_v47 }
 0x358   :  { %v417_v50 = vadd.f32 %v575_v48, %v415_v49 }
 0x35a   :  { %v418_v51 = vmin.f32 %v417_v50, 20.0 }
 0x35c   :  { %v419_v52 = vmul.f32 1.442695, %v418_v51 }
 0x35e   :  { %597 = vpow2.f32 %v419_v52 }
 0x364   :  { %v598_v53 = vpop.eup %597 }
 0x365   :  { %v421_v54 = vadd.f32 2.0, %v598_v53 }
 0x367   :  { %v422_v55 = vmul.f32 %v598_v53, %v421_v54 }
 0x369   :  { %v423_v56 = vadd.f32 2.0, %v422_v55 }
 0x36b   :  { %599 = vrcp.f32 %v423_v56  ;;  %v435_v60 = vand.u32 2147483648, %v423_v56  ;;  %v433_v62 = vand.u32 2147483647, %v423_v56  ;;  %vm429_vm11 = vweird.f32 %v423_v56 }
 0x36d   :  { %v436_v0 = vor.u32 1.1754944e-38, %v435_v60  ;;  %vm434_vm13 = vcmp.eq.f32.partialorder %v433_v62, 8.507059e+37 }
 0x371   :  { %v600_v57 = vpop.eup %599 }
 0x372   :  { %v425_v58 = vmul.f32 %v600_v57, %v423_v56  ;;  %vm430_vm10 = vweird.f32 %v600_v57 }
 0x373   :  { %vm431_vm12 = vmor %vm429_vm11, %vm430_vm10 }
 0x374   :  { %v426_v59 = vsub.f32 1.0, %v425_v58 }
 0x376   :  { %v427_v61 = vmul.f32 %v600_v57, %v426_v59 }
 0x378   :  { %v428_v63 = vadd.f32 %v600_v57, %v427_v61 }
 0x37a   :  { %v432_v1 = vsel %vm431_vm12, %v600_v57, %v428_v63 }
 0x37b   :  { %v437_v2 = vsel %vm434_vm13, %v436_v0, %v432_v1 }
 0x37c   :  { %v438_v3 = vmul.f32 %v437_v2, %v422_v55 }
 0x37e   :  { %v439_v4 = vmul.f32 %v438_v3, %v417_v50 }
 0x380   :  { %v440_v5 = vpack.c.bf16 %v439_v4, %v439_v4 }
 0x382   :  { %546 = vmatmul.msk.bf16.vlgmr.msrb.gmra.mxu0 %vm95_vm0, %v440_v5 }
 0x3ff   :  { %v475_v8 = vpop.f32.mrf.mxu0 }
 0x400   :  { %v476_v9 = vadd.f32 %v576_v7, %v475_v8 }
 0x402   :  { %479 = vst [vmem:[#allocation8 + $0x8] sm:$0xff] %v476_v9 }
 0x403   :  { %490 = dma.vmem_to_hbm [thread:$0]  %s486_s17, 256, %s488_s19, [#allocation4]  }
 0x407   :  { %v477_v10 = vpop.f32.mrf.mxu0 }
 0x408   :  { %701 = dma.done.wait [#allocation4], 256  }
 0x409   :  { %702 = vsyncadd [#allocation4], 4294967040 }
 0x40a   :  { %495 = vsyncpa [#allocation3], 1 }
 0x40b   :  { %496 = vsyncpa [#allocation6], 1 }
 0x40c   :  { %497 = vsyncpa [#allocation4], 1 }

</bundles_post_ra>
